<compile_context>
chip_gen: v7x
topology: tpu7x:2x2x1
jax: 0.10.0
libtpu: 0.0.40
codegen_flags: <defaults>
</compile_context>

<pallas_src>
import numpy as np
import jax
import jax.numpy as jnp
from jax.experimental import pallas as pl
from jax.experimental.pallas import tpu as pltpu

CIN = 3
COUT = 32
NUM_CLASSES = 2
LANE = 128  # conv output channels padded to the full vreg lane width (lane-dense store)


def _cdiv(a, b):
    return -(-a // b)


def _round_up(x, m):
    return _cdiv(x, m) * m


def _pad_axis(x, axis, target):
    pad = target - x.shape[axis]
    if pad <= 0:
        return x
    widths = [(0, 0)] * x.ndim
    widths[axis] = (0, pad)
    return jnp.pad(x, widths)


# ------------------------------ Pallas kernels ------------------------------

def _conv_relu_pool_kernel(a_ref, w_ref, b_ref, o_ref):
    """Fused 3x3 conv (im2col matmul) + 2x2 max-pool + bias + ReLU.

    a_ref : (4, tm, K)  bf16  -- leading axis = the 4 positions of the 2x2 pool window
    w_ref : (K, LANE)   bf16  -- conv weights, Cout zero-padded to LANE
    b_ref : (1, LANE)   f32   -- conv bias, zero-padded
    o_ref : (tm, LANE)  bf16  -- pooled ReLU'd conv output
    """
    tm, lanes = o_ref.shape
    k = a_ref.shape[2]
    # One 4x-taller MXU dot instead of four shallow ones (leading-dim collapse).
    a = a_ref[...].reshape(4 * tm, k)
    y = jnp.dot(a, w_ref[...], preferred_element_type=jnp.float32)
    y = jnp.max(y.reshape(4, tm, lanes), axis=0)       # 2x2 max-pool (VPU max of 4 slabs)
    y = jnp.maximum(y + b_ref[...], 0.0)               # bias + ReLU once (monotone, shared bias)
    o_ref[...] = y.astype(o_ref.dtype)


def _fc_kernel(a_ref, w_ref, b_ref, o_ref):
    """(N, K) @ (K, NUM_CLASSES) + bias; accumulates in the resident f32 output block."""
    @pl.when(pl.program_id(0) == 0)
    def _():
        o_ref[...] = jnp.broadcast_to(b_ref[...], o_ref.shape)

    o_ref[...] += jnp.dot(a_ref[...], w_ref[...], preferred_element_type=jnp.float32)


# ------------------------------ wrappers (glue) ------------------------------

def conv_relu_pool(x_nchw, w_conv, b_conv):
    """Conv2d(3,32,3,1,pad=1) + ReLU + MaxPool2d(2,2).

    Returns (N*Ho*Wo, LANE) bf16 rows ordered (n, ho, wo); channels >= COUT are zero.
    """
    N, C, H, W = x_nchw.shape
    assert C == CIN and H % 2 == 0 and W % 2 == 0
    Ho, Wo = H // 2, W // 2
    K = 9 * CIN

    # im2col glue (plain JAX), 2x2 pool window as the leading axis.
    x = jnp.transpose(x_nchw, (0, 2, 3, 1)).astype(jnp.bfloat16)          # NHWC, bf16
    xp = jnp.pad(x, ((0, 0), (1, 1), (1, 1), (0, 0)))                     # conv padding=1
    cols = [xp[:, ki:ki + H, kj:kj + W, :] for ki in range(3) for kj in range(3)]
    patches = jnp.stack(cols, axis=3)                                     # (N,H,W,9,Cin)
    patches = patches.reshape(N, Ho, 2, Wo, 2, K)
    patches = jnp.transpose(patches, (2, 4, 0, 1, 3, 5))                  # (2,2,N,Ho,Wo,K)
    a = patches.reshape(4, N * Ho * Wo, K)

    Mp = N * Ho * Wo
    # Big M tiles amortize per-step overhead and saturate HBM; keep >= 2 grid steps
    # so the "parallel" axis can be split across both v7x TensorCores.
    tm = max(64, min(2048, _round_up(_cdiv(Mp, 2), 64)))
    Mp_pad = _round_up(Mp, tm)
    a = _pad_axis(a, 1, Mp_pad)

    # weights: (Cout, Cin, 3, 3) -> (ki, kj, cin) x cout, Cout padded to LANE columns
    w2d = jnp.transpose(w_conv, (2, 3, 1, 0)).reshape(K, COUT)
    w2d = _pad_axis(w2d, 1, LANE).astype(jnp.bfloat16)
    b2d = _pad_axis(b_conv.reshape(1, COUT), 1, LANE).astype(jnp.float32)

    pooled = pl.pallas_call(
        _conv_relu_pool_kernel,
        out_shape=jax.ShapeDtypeStruct((Mp_pad, LANE), jnp.bfloat16),
        grid=(Mp_pad // tm,),
        in_specs=[
            pl.BlockSpec((4, tm, K), lambda i: (0, i, 0)),
            pl.BlockSpec((K, LANE), lambda i: (0, 0)),
            pl.BlockSpec((1, LANE), lambda i: (0, 0)),
        ],
        out_specs=pl.BlockSpec((tm, LANE), lambda i: (i, 0)),
        compiler_params=pltpu.CompilerParams(
            dimension_semantics=("parallel",)),
    )(a, w2d, b2d)
    return pooled[:Mp], (N, Ho, Wo)


def linear(pooled, dims, w_fc, b_fc):
    """Linear(COUT*Ho*Wo, NUM_CLASSES) applied to the NCHW-flattened conv output."""
    N, Ho, Wo = dims
    K2 = Ho * Wo * COUT

    # Narrow the pooled activation to its 32 real channels (cheap XLA copy) so the FC
    # weight can stream completely unpadded as (Ho*Wo*32, 2).
    a = pooled.reshape(N, Ho * Wo, LANE)[:, :, :COUT].reshape(N, K2)

    # PyTorch .view flattens as (c, ho, wo); our rows are (ho, wo, c) -> reorder W.
    w4 = w_fc.reshape(NUM_CLASSES, COUT, Ho, Wo)
    w2 = jnp.transpose(w4, (2, 3, 1, 0)).reshape(K2, NUM_CLASSES).astype(jnp.bfloat16)
    b2 = b_fc.reshape(1, NUM_CLASSES).astype(jnp.float32)

    # Single K step at small/medium sizes; tile K only when W would not fit in VMEM.
    tk = min(8192, _round_up(K2, 128))
    K2_pad = _round_up(K2, tk)
    a = _pad_axis(a, 1, K2_pad)
    w2 = _pad_axis(w2, 0, K2_pad)

    return pl.pallas_call(
        _fc_kernel,
        out_shape=jax.ShapeDtypeStruct((N, NUM_CLASSES), jnp.float32),
        grid=(K2_pad // tk,),
        in_specs=[
            pl.BlockSpec((N, tk), lambda k: (0, k)),
            pl.BlockSpec((tk, NUM_CLASSES), lambda k: (k, 0)),
            pl.BlockSpec((1, NUM_CLASSES), lambda k: (0, 0)),
        ],
        out_specs=pl.BlockSpec((N, NUM_CLASSES), lambda k: (0, 0)),
        compiler_params=pltpu.CompilerParams(
            dimension_semantics=("arbitrary",)),
    )(a, w2, b2)


@jax.jit
def simple_cnn_forward(params, x_nchw):
    """SimpleCNN.forward: conv1(x) -> relu -> maxpool -> flatten -> fc. Returns logits."""
    pooled, dims = conv_relu_pool(x_nchw.astype(jnp.float32),
                                  params["conv_w"], params["conv_b"])
    return linear(pooled, dims, params["fc_w"], params["fc_b"])


# ------------------------------ params & reference ------------------------------

def init_params(key, H, W):
    k1, k2, k3, k4 = jax.random.split(key, 4)
    fan_conv = CIN * 3 * 3
    fc_in = COUT * (H // 2) * (W // 2)
    return {
        "conv_w": jax.random.normal(k1, (COUT, CIN, 3, 3), jnp.float32) / np.sqrt(fan_conv),
        "conv_b": 0.05 * jax.random.normal(k2, (COUT,), jnp.float32),
        "fc_w": jax.random.normal(k3, (NUM_CLASSES, fc_in), jnp.float32) / np.sqrt(fc_in),
        "fc_b": 0.05 * jax.random.normal(k4, (NUM_CLASSES,), jnp.float32),
    }


def reference_forward(params, x):
    """Pure-JAX f32 reference (PyTorch semantics) for correctness checking."""
    y = jax.lax.conv_general_dilated(
        x.astype(jnp.float32), params["conv_w"].astype(jnp.float32),
        window_strides=(1, 1), padding=((1, 1), (1, 1)),
        dimension_numbers=("NCHW", "OIHW", "NCHW"))
    y = y + params["conv_b"][None, :, None, None]
    y = jnp.maximum(y, 0.0)
    y = jax.lax.reduce_window(y, -jnp.inf, jax.lax.max,
                              (1, 1, 2, 2), (1, 1, 2, 2), "VALID")
    flat = y.reshape(x.shape[0], -1)
    return flat @ params["fc_w"].T + params["fc_b"]


if __name__ == "__main__":
    key = jax.random.PRNGKey(0)
    pkey, xkey = jax.random.split(key)
    N, H, W = 2, 16, 16
    params = init_params(pkey, H, W)
    x = jax.random.normal(xkey, (N, CIN, H, W), jnp.float32)

    logits = jax.block_until_ready(simple_cnn_forward(params, x))

    assert logits.shape == (N, NUM_CLASSES), logits.shape
    assert bool(jnp.all(jnp.isfinite(logits)))

    # Tolerance tightened from 1e-1; remaining diff is bf16 input/weight rounding
    # (f32 MXU accumulation throughout).
    ref = reference_forward(params, x)
    max_err = float(jnp.max(jnp.abs(logits - ref)))
    assert bool(jnp.allclose(logits, ref, atol=3e-2, rtol=3e-2)), (logits, ref, max_err)

    print("KERNEL_OK")
</pallas_src>

<mosaic_0001>
module attributes {stable_mosaic.version = 11 : i64} {
  func.func @_conv_relu_pool_kernel(%arg0: i32, %arg1: memref<4x64x27xbf16, #tpu.memory_space<vmem>>, %arg2: memref<27x128xbf16, #tpu.memory_space<vmem>>, %arg3: memref<1x128xf32, #tpu.memory_space<vmem>>, %arg4: memref<64x128xbf16, #tpu.memory_space<vmem>>) attributes {dimension_semantics = [#tpu.dimension_semantics<parallel>], iteration_bounds = array<i64: 2>, scalar_prefetch = 0 : i64, scratch_operands = 0 : i64, tpu.core_type = #tpu.core_type<tc>, window_params = [{transform_indices = @transform_0, window_bounds = array<i64: 4, 64, 27>}, {pipeline_mode = #tpu.pipeline_mode<synchronous>, transform_indices = @transform_1, window_bounds = array<i64: 27, 128>}, {pipeline_mode = #tpu.pipeline_mode<synchronous>, transform_indices = @transform_2, window_bounds = array<i64: 1, 128>}, {transform_indices = @transform_3, window_bounds = array<i64: 64, 128>}]} {
    %c0 = arith.constant 0 : index
    %c0_0 = arith.constant 0 : index
    %c0_1 = arith.constant 0 : index
    %0 = vector.load %arg1[%c0, %c0_0, %c0_1] : memref<4x64x27xbf16, #tpu.memory_space<vmem>>, vector<4x64x27xbf16>
    %1 = vector.shape_cast %0 : vector<4x64x27xbf16> to vector<256x27xbf16>
    %c0_2 = arith.constant 0 : index
    %c0_3 = arith.constant 0 : index
    %2 = vector.load %arg2[%c0_2, %c0_3] : memref<27x128xbf16, #tpu.memory_space<vmem>>, vector<27x128xbf16>
    %cst = arith.constant dense<0.000000e+00> : vector<256x128xf32>
    %3 = tpu.matmul %1, %2, %cst {dimension_numbers = #tpu.dot_dimension_numbers<[1], [0], [0], [1], [0, 0, 1, 1], [], []>} : vector<256x27xbf16>, vector<27x128xbf16>, vector<256x128xf32> -> vector<256x128xf32>
    %4 = vector.shape_cast %3 : vector<256x128xf32> to vector<4x64x128xf32>
    %cst_4 = arith.constant dense<0xFF800000> : vector<64x128xf32>
    %5 = vector.multi_reduction <maximumf>, %4, %cst_4 [0] : vector<4x64x128xf32> to vector<64x128xf32>
    %c0_5 = arith.constant 0 : index
    %c0_6 = arith.constant 0 : index
    %6 = vector.load %arg3[%c0_5, %c0_6] : memref<1x128xf32, #tpu.memory_space<vmem>>, vector<1x128xf32>
    %7 = vector.broadcast %6 : vector<1x128xf32> to vector<64x128xf32>
    %8 = arith.addf %5, %7 : vector<64x128xf32>
    %cst_7 = arith.constant 0.000000e+00 : f32
    %9 = vector.broadcast %cst_7 : f32 to vector<64x128xf32>
    %10 = arith.maximumf %8, %9 : vector<64x128xf32>
    %11 = arith.truncf %10 : vector<64x128xf32> to vector<64x128xbf16>
    %c0_8 = arith.constant 0 : index
    %c0_9 = arith.constant 0 : index
    %12 = vector.load %arg4[%c0_8, %c0_9] : memref<64x128xbf16, #tpu.memory_space<vmem>>, vector<64x128xbf16>
    tpu.vector_store %arg4[%c0_8, %c0_9], %11 {strides = array<i32>} : memref<64x128xbf16, #tpu.memory_space<vmem>>, vector<64x128xbf16>,
    return
  }
  func.func @transform_0(%arg0: i32) -> (i32, i32, i32) {
    %c0_i32 = arith.constant 0 : i32
    %c0_i32_0 = arith.constant 0 : i32
    %c0_i32_1 = arith.constant 0 : i32
    return %c0_i32, %arg0, %c0_i32_0 : i32, i32, i32
  }
  func.func @transform_1(%arg0: i32) -> (i32, i32) {
    %c0_i32 = arith.constant 0 : i32
    %c0_i32_0 = arith.constant 0 : i32
    %c0_i32_1 = arith.constant 0 : i32
    return %c0_i32, %c0_i32_0 : i32, i32
  }
  func.func @transform_2(%arg0: i32) -> (i32, i32) {
    %c0_i32 = arith.constant 0 : i32
    %c0_i32_0 = arith.constant 0 : i32
    %c0_i32_1 = arith.constant 0 : i32
    return %c0_i32, %c0_i32_0 : i32, i32
  }
  func.func @transform_3(%arg0: i32) -> (i32, i32) {
    %c0_i32 = arith.constant 0 : i32
    %c0_i32_0 = arith.constant 0 : i32
    return %arg0, %c0_i32 : i32, i32
  }
}

module attributes {stable_mosaic.version = 11 : i64} {
  func.func @_fc_kernel(%arg0: i32, %arg1: memref<2x2048xbf16, #tpu.memory_space<vmem>>, %arg2: memref<2048x2xbf16, #tpu.memory_space<vmem>>, %arg3: memref<1x2xf32, #tpu.memory_space<vmem>>, %arg4: memref<2x2xf32, #tpu.memory_space<vmem>>) attributes {dimension_semantics = [#tpu.dimension_semantics<arbitrary>], iteration_bounds = array<i64: 1>, scalar_prefetch = 0 : i64, scratch_operands = 0 : i64, tpu.core_type = #tpu.core_type<tc>, window_params = [{transform_indices = @transform_0, window_bounds = array<i64: 2, 2048>}, {transform_indices = @transform_1, window_bounds = array<i64: 2048, 2>}, {pipeline_mode = #tpu.pipeline_mode<synchronous>, transform_indices = @transform_2, window_bounds = array<i64: 1, 2>}, {pipeline_mode = #tpu.pipeline_mode<synchronous>, transform_indices = @transform_3, window_bounds = array<i64: 2, 2>}]} {
    %c0_i32 = arith.constant 0 : i32
    %0 = arith.cmpi eq, %arg0, %c0_i32 : i32
    %1 = arith.extui %0 : i1 to i32
    %c0_i32_0 = arith.constant 0 : i32
    %2 = arith.cmpi ne, %1, %c0_i32_0 : i32
    scf.if %2 {
      %c0_8 = arith.constant 0 : index
      %c0_9 = arith.constant 0 : index
      %9 = vector.load %arg3[%c0_8, %c0_9] : memref<1x2xf32, #tpu.memory_space<vmem>>, vector<1x2xf32>
      %10 = vector.shape_cast %9 : vector<1x2xf32> to vector<1x2xf32>
      %11 = vector.broadcast %10 : vector<1x2xf32> to vector<2x2xf32>
      %c0_10 = arith.constant 0 : index
      %c0_11 = arith.constant 0 : index
      %12 = vector.load %arg4[%c0_10, %c0_11] : memref<2x2xf32, #tpu.memory_space<vmem>>, vector<2x2xf32>
      tpu.vector_store %arg4[%c0_10, %c0_11], %11 {strides = array<i32>} : memref<2x2xf32, #tpu.memory_space<vmem>>, vector<2x2xf32>,
    } else {
    }
    %c0 = arith.constant 0 : index
    %c0_1 = arith.constant 0 : index
    %3 = vector.load %arg4[%c0, %c0_1] : memref<2x2xf32, #tpu.memory_space<vmem>>, vector<2x2xf32>
    %c0_2 = arith.constant 0 : index
    %c0_3 = arith.constant 0 : index
    %4 = vector.load %arg1[%c0_2, %c0_3] : memref<2x2048xbf16, #tpu.memory_space<vmem>>, vector<2x2048xbf16>
    %c0_4 = arith.constant 0 : index
    %c0_5 = arith.constant 0 : index
    %5 = vector.load %arg2[%c0_4, %c0_5] : memref<2048x2xbf16, #tpu.memory_space<vmem>>, vector<2048x2xbf16>
    %cst = arith.constant dense<0.000000e+00> : vector<2x2xf32>
    %6 = tpu.matmul %4, %5, %cst {dimension_numbers = #tpu.dot_dimension_numbers<[1], [0], [0], [1], [0, 0, 1, 1], [], []>} : vector<2x2048xbf16>, vector<2048x2xbf16>, vector<2x2xf32> -> vector<2x2xf32>
    %7 = arith.addf %3, %6 : vector<2x2xf32>
    %c0_6 = arith.constant 0 : index
    %c0_7 = arith.constant 0 : index
    %8 = vector.load %arg4[%c0_6, %c0_7] : memref<2x2xf32, #tpu.memory_space<vmem>>, vector<2x2xf32>
    tpu.vector_store %arg4[%c0_6, %c0_7], %7 {strides = array<i32>} : memref<2x2xf32, #tpu.memory_space<vmem>>, vector<2x2xf32>,
    return
  }
  func.func @transform_0(%arg0: i32) -> (i32, i32) {
    %c0_i32 = arith.constant 0 : i32
    %c0_i32_0 = arith.constant 0 : i32
    return %c0_i32, %arg0 : i32, i32
  }
  func.func @transform_1(%arg0: i32) -> (i32, i32) {
    %c0_i32 = arith.constant 0 : i32
    %c0_i32_0 = arith.constant 0 : i32
    return %arg0, %c0_i32 : i32, i32
  }
  func.func @transform_2(%arg0: i32) -> (i32, i32) {
    %c0_i32 = arith.constant 0 : i32
    %c0_i32_0 = arith.constant 0 : i32
    %c0_i32_1 = arith.constant 0 : i32
    return %c0_i32, %c0_i32_0 : i32, i32
  }
  func.func @transform_3(%arg0: i32) -> (i32, i32) {
    %c0_i32 = arith.constant 0 : i32
    %c0_i32_0 = arith.constant 0 : i32
    %c0_i32_1 = arith.constant 0 : i32
    return %c0_i32, %c0_i32_0 : i32, i32
  }
}

</mosaic_0001>

<bundles_post_ra>
// kernel: simple_cnn_forward.2
= control target key start
LH: loop header
LB: loop body
LE: loop exit
PB: predicated region body
PF: predicated region fallthrough
CT: control target
= control target key end

     0   :  { %s1067_s12 = smov 0   ;;  %s1069_s13 = smov 0   ;;  %s1180_s0 = inlined_call_operand.vmem [shape: bf16[4,128,27], index: 0, kind: input, shape index: {}]   ;;  %s1181_s1 = inlined_call_operand.vmem [shape: bf16[27,128], index: 1, kind: input, shape index: {}]   ;;  %s1182_s2 = inlined_call_operand.vmem [shape: f32[1,128], index: 2, kind: input, shape index: {}]   ;;  %s1183_s3 = inlined_call_operand.vmem [shape: bf16[128,128], index: 3, kind: output, shape index: {}]  }
   0x1   :  { %s1071_s14 = smov 0  }
   0x2 LB: > { %s833_s15 = sadd.s32 4294967295, %s1044_s14   ;;  %s1084_s16 = sadd.s32 1, %s1044_s14   ;;  %s1044_s14 = sphi %s1071_s14, %s1186_s14   ;;  %s1040_s13 = sphi %s1069_s13, %s1185_s13   ;;  %s1036_s12 = sphi %s1067_s12, %s1184_s12  }
   0x3   : > { %s17_s17 = ssub.s32 %s1044_s14, %s1084_s16  ;;  %s20_s18 = sadd.s32 1, %s1040_s13 }
   0x4   : > { %p18_p0 = scmp.eq.s32.totalorder %s17_s17, 0  ;;  %p27_p1 = scmp.ne.s32.totalorder %s1040_s13, %s1036_s12 }
   0x5   : > { %p28_p2 = scmp.eq.s32.totalorder %s1044_s14, 0  ;;  %p836_p4 = scmp.ge.s32.totalorder %s1044_s14, 2 }
   0x6   : > { %s1093_s19 = scalar_select %p18_p0, %s1040_s13, %s20_s18  }
   0x7   : > { %p29_p3 = por %p28_p2, %p27_p1  ;;  %127 = sbr.rel (%p836_p4) target bundleno = 26 (0x1a), region = 24 }
   0xe   : > { %130 = sbr.rel (!%p29_p3) target bundleno = 26 (0x1a), region = 28  ;;  %s132_s20 = sand.u32 (%p29_p3), 1, %s1040_s13  }
   0xf   : > { %s889_s21 = sshll.u32 (%p29_p3), %s1044_s14, 5  ;;  %s837_s22 = sshll.u32 (%p29_p3), %s132_s20, 7 }
  0x10   : > { %s1101_s25 = scalar_lea.vmem (%p29_p3), %s1180_s0, %s889_s21  ;;  %s134_s26 = scalar_lea.vmem (%p29_p3), [#allocation2], %s837_s22 }
  0x11   : > { %v153_v0 = vld [vmem:[%s1101_s25] sm:$0xff] (%p29_p3)   ;;  %v157_v1 = vld [vmem:[%s1101_s25 + $0x8] sm:$0xff] (%p29_p3)   ;;  %v161_v2 = vld [vmem:[%s1101_s25 + $0x10] sm:$0xff] (%p29_p3)  }
  0x12   : > { %154 = vst [vmem:[%s134_s26] sm:$0xff] (%p29_p3), %v153_v0   ;;  %158 = vst [vmem:[%s134_s26 + $0x8] sm:$0xff] (%p29_p3), %v157_v1   ;;  %v165_v3 = vld [vmem:[%s1101_s25 + $0x18] sm:$0xff] (%p29_p3)   ;;  %v169_v4 = vld [vmem:[%s1101_s25 + $0x40] sm:$0xff] (%p29_p3)  }
  0x13   : > { %162 = vst [vmem:[%s134_s26 + $0x10] sm:$0xff] (%p29_p3), %v161_v2   ;;  %v173_v5 = vld [vmem:[%s1101_s25 + $0x48] sm:$0xff] (%p29_p3)   ;;  %166 = vst [vmem:[%s134_s26 + $0x18] sm:$0xff] (%p29_p3), %v165_v3   ;;  %v177_v6 = vld [vmem:[%s1101_s25 + $0x50] sm:$0xff] (%p29_p3)  }
  0x14   : > { %170 = vst [vmem:[%s134_s26 + $0x20] sm:$0xff] (%p29_p3), %v169_v4   ;;  %174 = vst [vmem:[%s134_s26 + $0x28] sm:$0xff] (%p29_p3), %v173_v5   ;;  %v181_v7 = vld [vmem:[%s1101_s25 + $0x58] sm:$0xff] (%p29_p3)   ;;  %v185_v8 = vld [vmem:[%s1101_s25 + $0x80] sm:$0xff] (%p29_p3)  }
  0x15   : > { %178 = vst [vmem:[%s134_s26 + $0x30] sm:$0xff] %v177_v6   ;;  %182 = vst [vmem:[%s134_s26 + $0x38] sm:$0xff] %v181_v7   ;;  %v189_v9 = vld [vmem:[%s1101_s25 + $0x88] sm:$0xff]   ;;  %v193_v10 = vld [vmem:[%s1101_s25 + $0x90] sm:$0xff]  }
  0x16   : > { %186 = vst [vmem:[%s134_s26 + $0x40] sm:$0xff] %v185_v8   ;;  %v197_v11 = vld [vmem:[%s1101_s25 + $0x98] sm:$0xff]   ;;  %190 = vst [vmem:[%s134_s26 + $0x48] sm:$0xff] %v189_v9   ;;  %v201_v12 = vld [vmem:[%s1101_s25 + $0xc0] sm:$0xff]  }
  0x17   : > { %194 = vst [vmem:[%s134_s26 + $0x50] sm:$0xff] %v193_v10   ;;  %198 = vst [vmem:[%s134_s26 + $0x58] sm:$0xff] %v197_v11   ;;  %v205_v13 = vld [vmem:[%s1101_s25 + $0xc8] sm:$0xff]   ;;  %v209_v14 = vld [vmem:[%s1101_s25 + $0xd0] sm:$0xff]  }
  0x18   : > { %202 = vst [vmem:[%s134_s26 + $0x60] sm:$0xff] %v201_v12   ;;  %206 = vst [vmem:[%s134_s26 + $0x68] sm:$0xff] %v205_v13   ;;  %v213_v15 = vld [vmem:[%s1101_s25 + $0xd8] sm:$0xff]  }
  0x19   : > { %210 = vst [vmem:[%s134_s26 + $0x70] sm:$0xff] %v209_v14   ;;  %214 = vst [vmem:[%s134_s26 + $0x78] sm:$0xff] %v213_v15  }
  0x1a PF: > { %p840_p5 = scmp.ge.s32.totalorder %s1044_s14, 1  ;;  %p302_p6 = scmp.lt.s32.totalorder %s1044_s14, 3 }
  0x1c   : > { %p303_p7 = pnand %p840_p5, %p302_p6 }
  0x1d   : > { %v1004_v16 = vld [vmem:[%s1181_s1] sm:$0xff] (!%p303_p7)   ;;  %vm516_vm0 = vcmask (!%p303_p7), 1044480   ;;  %v1005_v17 = vld [vmem:[%s1181_s1 + $0x8] sm:$0x3f] (!%p303_p7)   ;;  %vm517_vm1 = vcmask (!%p303_p7), 1045504   ;;  %s309_s4 = sand.u32 (!%p303_p7), 1, %s1036_s12  }
  0x1e   : > { %306 = sbr.rel (%p303_p7) target bundleno = 291 (0x123), region = 69  ;;  %939 = vmatprep.subr.bf16.mxu0 (!%p303_p7), %v1004_v16  ;;  %975 = vmatprep.subr.bf16.mxu1 (!%p303_p7), %v1004_v16  ;;  %v1046_v18 = vmov (!%p303_p7), 65535   ;;  %s841_s5 = sshll.u32 (!%p303_p7), %s309_s4, 7  ;;  %vm467_vm2 = vcmask (!%p303_p7), 220160   ;;  %v878_v2 = vld [vmem:[%s1182_s2] ss:$0 sm:$0xff] (!%p303_p7) }
  0x1f   : > { %940 = vmatpush3.bf16.msra.mxu0 (!%p303_p7), %v1004_v16  ;;  %977 = vmatpush3.bf16.msra.mxu1 (!%p303_p7), %v1004_v16  ;;  %v518_v19 = vsel (!%p303_p7), %vm516_vm0, 4294967295, %v1046_v18  ;;  %s1128_s6 = scalar_lea.vmem (!%p303_p7), [#allocation2], %s841_s5  ;;  %s842_s7 = sshll.u32 (!%p303_p7), %s833_s15, 3 }
  0x20   : > { %v519_v20 = vsel (!%p303_p7), %vm517_vm1, %v518_v19, 0  ;;  %v1006_v22 = vld [vmem:[%s1128_s6] sm:$0xff] (!%p303_p7)   ;;  %v1007_v23 = vld [vmem:[%s1128_s6 + $0x8] sm:$0xff] (!%p303_p7)   ;;  %v1010_v26 = vld [vmem:[%s1128_s6 + $0x10] sm:$0xff] (!%p303_p7)   ;;  %p334_p8 = scmp.lt.s32.totalorder (!%p303_p7), %s842_s7, 15 }
  0x21   : > { %v521_v21 = vand.u32 (!%p303_p7), %v1005_v17, %v519_v20  ;;  %v1008_v24 = vld [vmem:[%s1128_s6 + $0x40] sm:$0xff] (!%p303_p7)   ;;  %v1009_v25 = vld [vmem:[%s1128_s6 + $0x48] sm:$0xff] (!%p303_p7)   ;;  %943 = vmatprep.mubr.msk.bf16.mxu0 (!%p303_p7), %vm467_vm2, %v1006_v22  ;;  %v1012_v27 = vld [vmem:[%s1128_s6 + $0x50] sm:$0xff] (!%p303_p7)  }
  0x22   : > { %959 = vmatprep.mubr.msk.bf16.mxu1 (!%p303_p7), %vm467_vm2, %v1008_v24  ;;  %v1011_v28 = vld [vmem:[%s1128_s6 + $0x18] sm:$0xff] (!%p303_p7)   ;;  %v1014_v30 = vld [vmem:[%s1128_s6 + $0x20] sm:$0xff] (!%p303_p7)   ;;  %v1015_v32 = vld [vmem:[%s1128_s6 + $0x28] sm:$0xff] (!%p303_p7)  }
  0x23   : > { %941 = vmatprep.subr.bf16.mxu0 (!%p303_p7), %v521_v21  ;;  %976 = vmatprep.subr.bf16.mxu1 (!%p303_p7), %v521_v21  ;;  %v1013_v29 = vld [vmem:[%s1128_s6 + $0x58] sm:$0xff] (!%p303_p7)   ;;  %v1016_v31 = vld [vmem:[%s1128_s6 + $0x60] sm:$0xff] (!%p303_p7)   ;;  %v1017_v33 = vld [vmem:[%s1128_s6 + $0x68] sm:$0xff] (!%p303_p7)  }
  0x24   : > { %942 = vmatpush3.bf16.msra.mxu0 (!%p303_p7), %v521_v21  ;;  %978 = vmatpush3.bf16.msra.mxu1 (!%p303_p7), %v521_v21  ;;  %v1018_v34 = vld [vmem:[%s1128_s6 + $0x30] sm:$0xff] (!%p303_p7)   ;;  %v1019_v36 = vld [vmem:[%s1128_s6 + $0x38] sm:$0xff] (!%p303_p7)  }
  0x25   : > { %v1020_v35 = vld [vmem:[%s1128_s6 + $0x70] sm:$0xff]   ;;  %v1021_v37 = vld [vmem:[%s1128_s6 + $0x78] sm:$0xff]   ;;  %s1188_s7 = smov (!%p334_p8, %s842_s7), 15 }
  0x26   : > { %s843_s10 = sshll.u32 %s1188_s7, 2 }
  0x27   : > { %944 = vmatmul.mubr.msk.bf16.vlgmr.msra.gmra.mrb[0].mxu0 %vm467_vm2, %v1007_v23  ;;  %960 = vmatmul.mubr.msk.bf16.vlgmr.msra.gmra.mrb[0].mxu1 %vm467_vm2, %v1009_v25  ;;  %s337_s14 = scalar_lea.vmem %s1183_s3, %s843_s10 }
  0x28   : > { %947 = vmatprep.mubr.msk.bf16.mxu0 %vm467_vm2, %v1010_v26  ;;  %963 = vmatprep.mubr.msk.bf16.mxu1 %vm467_vm2, %v1012_v27 }
  0x2f   : > { %948 = vmatmul.mubr.msk.bf16.gmra.mrb[4].mxu0 %vm467_vm2, %v1011_v28  ;;  %964 = vmatmul.mubr.msk.bf16.gmra.mrb[4].mxu1 %vm467_vm2, %v1013_v29 }
  0x30   : > { %951 = vmatprep.mubr.msk.bf16.mxu0 %vm467_vm2, %v1014_v30  ;;  %967 = vmatprep.mubr.msk.bf16.mxu1 %vm467_vm2, %v1016_v31 }
  0x37   : > { %952 = vmatmul.mubr.msk.bf16.gmra.mrb[8].mxu0 %vm467_vm2, %v1015_v32  ;;  %968 = vmatmul.mubr.msk.bf16.gmra.mrb[8].mxu1 %vm467_vm2, %v1017_v33 }
  0x38   : > { %955 = vmatprep.mubr.msk.bf16.mxu0 %vm467_vm2, %v1018_v34  ;;  %971 = vmatprep.mubr.msk.bf16.mxu1 %vm467_vm2, %v1020_v35 }
  0x3f   : > { %956 = vmatmul.mubr.msk.bf16.gmra.mrb[12].mxu0 %vm467_vm2, %v1019_v36  ;;  %972 = vmatmul.mubr.msk.bf16.gmra.mrb[12].mxu1 %vm467_vm2, %v1021_v37 }
  0xfa   : > { %v945_v38 = vpop.f32.mrb[0].mxu0  ;;  %v961_v39 = vpop.f32.mrb[0].mxu1 }
  0xfb   : > { %v557_v40 = vpop.f32.mrb[1].mxu0  ;;  %v621_v41 = vpop.f32.mrb[1].mxu1 }
  0xfc   : > { %v946_v42 = vpop.f32.mrb[2].mxu0  ;;  %v962_v43 = vpop.f32.mrb[2].mxu1 }
  0xfd   : > { %v560_v44 = vpop.f32.mrb[3].mxu0  ;;  %v624_v45 = vpop.f32.mrb[3].mxu1 }
 0x102   : > { %v949_v46 = vpop.f32.mrb[4].mxu0  ;;  %v965_v47 = vpop.f32.mrb[4].mxu1 }
 0x103   : > { %v573_v48 = vpop.f32.mrb[5].mxu0  ;;  %v637_v49 = vpop.f32.mrb[5].mxu1 }
 0x104   : > { %v950_v50 = vpop.f32.mrb[6].mxu0  ;;  %v966_v51 = vpop.f32.mrb[6].mxu1 }
 0x105   : > { %v576_v52 = vpop.f32.mrb[7].mxu0  ;;  %v640_v53 = vpop.f32.mrb[7].mxu1 }
 0x10a   : > { %v953_v54 = vpop.f32.mrb[8].mxu0  ;;  %v969_v55 = vpop.f32.mrb[8].mxu1 }
 0x10b   : > { %v690_v56 = vmax.f32 %v945_v38, %v953_v54  ;;  %v589_v57 = vpop.f32.mrb[9].mxu0  ;;  %v653_v58 = vpop.f32.mrb[9].mxu1 }
 0x10c   : > { %v684_v59 = vmax.f32 %v557_v40, %v589_v57  ;;  %v954_v60 = vpop.f32.mrb[10].mxu0  ;;  %v970_v61 = vpop.f32.mrb[10].mxu1 }
 0x10d   : > { %v691_v62 = vmax.f32 %v690_v56, %v961_v39  ;;  %v693_v63 = vmax.f32 %v946_v42, %v954_v60  ;;  %v592_v0 = vpop.f32.mrb[11].mxu0  ;;  %v656_v1 = vpop.f32.mrb[11].mxu1 }
 0x10e   : > { %v685_v3 = vmax.f32 %v684_v59, %v621_v41  ;;  %v687_v4 = vmax.f32 %v560_v44, %v592_v0 }
 0x10f   : > { %v692_v5 = vmax.f32 %v691_v62, %v969_v55  ;;  %v694_v6 = vmax.f32 %v693_v63, %v962_v43 }
 0x110   : > { %v686_v7 = vmax.f32 %v685_v3, %v653_v58  ;;  %v688_v8 = vmax.f32 %v687_v4, %v624_v45 }
 0x111   : > { %v717_v9 = vadd.f32 %v878_v2, %v692_v5  ;;  %v695_v10 = vmax.f32 %v694_v6, %v970_v61 }
 0x112   : > { %v715_v11 = vadd.f32 %v878_v2, %v686_v7  ;;  %v689_v12 = vmax.f32 %v688_v8, %v656_v1  ;;  %v957_v13 = vpop.f32.mrb[12].mxu0  ;;  %v973_v14 = vpop.f32.mrb[12].mxu1 }
 0x113   : > { %v718_v15 = vadd.f32 %v878_v2, %v695_v10  ;;  %v702_v16 = vmax.f32 %v949_v46, %v957_v13  ;;  %v605_v17 = vpop.f32.mrb[13].mxu0  ;;  %v669_v18 = vpop.f32.mrb[13].mxu1  ;;  %v725_v23 = vmax.f32 %v717_v9, 0.0 }
 0x114   : > { %v716_v19 = vadd.f32 %v878_v2, %v689_v12  ;;  %v696_v20 = vmax.f32 %v573_v48, %v605_v17  ;;  %v958_v21 = vpop.f32.mrb[14].mxu0  ;;  %v974_v22 = vpop.f32.mrb[14].mxu1  ;;  %v723_v29 = vmax.f32 %v715_v11, 0.0 }
 0x115   : > { %v726_v24 = vmax.f32 %v718_v15, 0.0  ;;  %v703_v25 = vmax.f32 %v702_v16, %v965_v47  ;;  %v705_v26 = vmax.f32 %v950_v50, %v958_v21  ;;  %v608_v27 = vpop.f32.mrb[15].mxu0  ;;  %v672_v28 = vpop.f32.mrb[15].mxu1 }
 0x116   : > { %v724_v30 = vmax.f32 %v716_v19, 0.0  ;;  %v697_v31 = vmax.f32 %v696_v20, %v637_v49  ;;  %v699_v32 = vmax.f32 %v576_v52, %v608_v27 }
 0x117   : > { %v906_v33 = vpack.c.bf16 %v726_v24, %v725_v23  ;;  %v704_v34 = vmax.f32 %v703_v25, %v973_v14  ;;  %v706_v35 = vmax.f32 %v705_v26, %v966_v51 }
 0x118   : > { %v901_v36 = vpack.c.bf16 %v724_v30, %v723_v29  ;;  %v698_v37 = vmax.f32 %v697_v31, %v669_v18  ;;  %v700_v38 = vmax.f32 %v699_v32, %v640_v53 }
 0x119   : > { %918 = vst [vmem:[%s337_s14 + $0x8] sm:$0xff] %v906_v33   ;;  %v721_v39 = vadd.f32 %v878_v2, %v704_v34  ;;  %v707_v40 = vmax.f32 %v706_v35, %v974_v22 }
 0x11a   : > { %902 = vst [vmem:[%s337_s14] sm:$0xff] %v901_v36   ;;  %v719_v41 = vadd.f32 %v878_v2, %v698_v37  ;;  %v701_v42 = vmax.f32 %v700_v38, %v672_v28 }
 0x11b   : > { %v722_v43 = vadd.f32 %v878_v2, %v707_v40  ;;  %v729_v45 = vmax.f32 %v721_v39, 0.0 }
 0x11c   : > { %v720_v44 = vadd.f32 %v878_v2, %v701_v42  ;;  %v727_v47 = vmax.f32 %v719_v41, 0.0 }
 0x11d   : > { %v730_v46 = vmax.f32 %v722_v43, 0.0 }
 0x11e   : > { %v728_v48 = vmax.f32 %v720_v44, 0.0 }
 0x11f   : > { %v916_v49 = vpack.c.bf16 %v730_v46, %v729_v45 }
 0x120   : > { %v911_v50 = vpack.c.bf16 %v728_v48, %v727_v47 }
 0x121   : > { %920 = vst [vmem:[%s337_s14 + $0x18] sm:$0xff] %v916_v49  }
 0x122   : > { %919 = vst [vmem:[%s337_s14 + $0x10] sm:$0xff] %v911_v50  }
 0x123 PF: > { %p10_p9 = scmp.ge.s32.totalorder %s1084_s16, 4   ;;  %s1184_s12 = smov %s1040_s13 }
 0x124   : > { %s1185_s13 = smov %s1093_s19  ;;  %s1186_s14 = smov %s1084_s16 }
 0x125   :  { %12 = sbr.rel (!%p10_p9) target bundleno = 2 (0x2), region = 108 }

// kernel: simple_cnn_forward.3
= control target key start
LH: loop header
LB: loop body
LE: loop exit
PB: predicated region body
PF: predicated region fallthrough
CT: control target
= control target key end

     0   :  { %v294_v28 = vlaneseq  ;;  %v1970_v36 = vmov 1966171168   ;;  %s2423_s0 = inlined_call_operand.vmem [shape: bf16[2,2048], index: 0, kind: input, shape index: {}]   ;;  %s2424_s1 = inlined_call_operand.vmem [shape: bf16[2048,2], index: 1, kind: input, shape index: {}]   ;;  %s2425_s2 = inlined_call_operand.vmem [shape: f32[1,2], index: 2, kind: input, shape index: {}]   ;;  %s2426_s3 = inlined_call_operand.hbm [shape: f32[2,2], index: 3, kind: output, shape index: {}]  }
   0x1   :  { %v1816_v0 = vld [vmem:[%s2424_s1 + $0x40] sm:$0xff]   ;;  %v1820_v4 = vld [vmem:[%s2424_s1 + $0x48] sm:$0xff]   ;;  %v1824_v8 = vld [vmem:[%s2424_s1 + $0x50] sm:$0xff]   ;;  %v292_v37 = vunpack.c.l.s4 %v1970_v36 }
   0x2   :  { %v1817_v1 = vld [vmem:[%s2424_s1 + $0xc0] sm:$0xff]   ;;  %1638 = vmatprep.subr.bf16.mxu0 %v1816_v0  ;;  %v1821_v5 = vld [vmem:[%s2424_s1 + $0xc8] sm:$0xff]   ;;  %v1825_v9 = vld [vmem:[%s2424_s1 + $0xd0] sm:$0xff]   ;;  %v295_v33 = vshrl.u32 %v294_v28, 7 }
   0x3   :  { %v1818_v2 = vld [vmem:[%s2424_s1] sm:$0xff]   ;;  %1660 = vmatprep.subr.bf16.mxu1 %v1817_v1  ;;  %v1822_v6 = vld [vmem:[%s2424_s1 + $0x8] sm:$0xff]   ;;  %v1826_v10 = vld [vmem:[%s2424_s1 + $0x10] sm:$0xff]   ;;  %v293_v40 = vunpack.c.0.s8 %v292_v37 }
   0x4   :  { %v1819_v3 = vld [vmem:[%s2424_s1 + $0x80] sm:$0xff]   ;;  %1639 = vmatpush3.bf16.msra.mxu0 %v1818_v2  ;;  %v1823_v7 = vld [vmem:[%s2424_s1 + $0x88] sm:$0xff]   ;;  %v1827_v11 = vld [vmem:[%s2424_s1 + $0x90] sm:$0xff]  }
   0x5   :  { %1661 = vmatpush3.bf16.msra.mxu1 %v1819_v3  ;;  %1640 = vmatprep.subr.bf16.mxu0 %v1820_v4  ;;  %v1828_v12 = vld [vmem:[%s2424_s1 + $0x58] sm:$0xff]   ;;  %v1832_v16 = vld [vmem:[%s2424_s1 + $0x60] sm:$0xff]   ;;  %v1836_v20 = vld [vmem:[%s2424_s1 + $0x68] sm:$0xff]   ;;  %v2097_v41 = vsub.s32 %v293_v40, %v295_v33 }
   0x6   :  { %1662 = vmatprep.subr.bf16.mxu1 %v1821_v5  ;;  %v1829_v13 = vld [vmem:[%s2424_s1 + $0xd8] sm:$0xff]   ;;  %v1833_v17 = vld [vmem:[%s2424_s1 + $0xe0] sm:$0xff]   ;;  %v1837_v21 = vld [vmem:[%s2424_s1 + $0xe8] sm:$0xff]  }
   0x7   :  { %v1830_v14 = vld [vmem:[%s2424_s1 + $0x18] sm:$0xff]   ;;  %v1834_v18 = vld [vmem:[%s2424_s1 + $0x20] sm:$0xff]   ;;  %v1838_v22 = vld [vmem:[%s2424_s1 + $0x28] sm:$0xff]  }
   0x8   :  { %1641 = vmatpush3.bf16.msra.mxu0 %v1822_v6  ;;  %v1831_v15 = vld [vmem:[%s2424_s1 + $0x98] sm:$0xff]   ;;  %v1835_v19 = vld [vmem:[%s2424_s1 + $0xa0] sm:$0xff]   ;;  %v1839_v23 = vld [vmem:[%s2424_s1 + $0xa8] sm:$0xff]  }
   0x9   :  { %1663 = vmatpush3.bf16.msra.mxu1 %v1823_v7  ;;  %1642 = vmatprep.subr.bf16.mxu0 %v1824_v8  ;;  %v1840_v24 = vld [vmem:[%s2424_s1 + $0x70] sm:$0xff]   ;;  %v1844_v29 = vld [vmem:[%s2424_s1 + $0x78] sm:$0xff]   ;;  %v30_v34 = vld [vmem:[%s2423_s0] sm:$0xff] }
   0xa   :  { %1664 = vmatprep.subr.bf16.mxu1 %v1825_v9  ;;  %v1841_v25 = vld [vmem:[%s2424_s1 + $0xf0] sm:$0xff]   ;;  %v1845_v30 = vld [vmem:[%s2424_s1 + $0xf8] sm:$0xff]   ;;  %v1849_v35 = vld [vmem:[%s2424_s1 + $0x140] sm:$0xff]   ;;  %v290_v39 = vcombine.high %v30_v34, %v30_v34  ;;  %v297_v42 = vrot.slane %v30_v34, %v2097_v41 }
   0xb   :  { %v1842_v26 = vld [vmem:[%s2424_s1 + $0x30] sm:$0xff]   ;;  %v1846_v31 = vld [vmem:[%s2424_s1 + $0x38] sm:$0xff]   ;;  %v1850_v38 = vld [vmem:[%s2424_s1 + $0x1c0] sm:$0xff]  }
   0xc   :  { %1643 = vmatpush3.bf16.msra.mxu0 %v1826_v10  ;;  %v1843_v27 = vld [vmem:[%s2424_s1 + $0xb0] sm:$0xff]   ;;  %v1847_v32 = vld [vmem:[%s2424_s1 + $0xb8] sm:$0xff]   ;;  %v2101_v43 = vrot.slane %v290_v39, %v2097_v41  ;;  %v305_v44 = vcombine.high %v297_v42, %v297_v42  ;;  %v313_v45 = vrot.slane %v297_v42, %v2097_v41  ;;  %v1851_v48 = vld [vmem:[%s2424_s1 + $0x100] sm:$0xff]  }
   0xd   :  { %1665 = vmatpush3.bf16.msra.mxu1 %v1827_v11  ;;  %1644 = vmatprep.subr.bf16.mxu0 %v1828_v12  ;;  %v1853_v51 = vld [vmem:[%s2424_s1 + $0x148] sm:$0xff]   ;;  %v1852_v53 = vld [vmem:[%s2424_s1 + $0x180] sm:$0xff]   ;;  %v1857_v57 = vld [vmem:[%s2424_s1 + $0x150] sm:$0xff]  }
   0xe   :  { %1666 = vmatprep.subr.bf16.mxu1 %v1829_v13  ;;  %v306_v46 = vcombine.high %v2101_v43, %v2101_v43  ;;  %v327_v47 = vrot.slane %v305_v44, %v2097_v41  ;;  %v335_v50 = vcombine.high %v313_v45, %v313_v45  ;;  %v1854_v54 = vld [vmem:[%s2424_s1 + $0x1c8] sm:$0xff]   ;;  %v1858_v59 = vld [vmem:[%s2424_s1 + $0x1d0] sm:$0xff]   ;;  %v1861_v61 = vld [vmem:[%s2424_s1 + $0x158] sm:$0xff]  }
   0xf   :  { %v1855_v56 = vld [vmem:[%s2424_s1 + $0x108] sm:$0xff]   ;;  %v1859_v60 = vld [vmem:[%s2424_s1 + $0x110] sm:$0xff]   ;;  %v1862_v63 = vld [vmem:[%s2424_s1 + $0x1d8] sm:$0xff]  }
  0x10   :  { %1645 = vmatpush3.bf16.msra.mxu0 %v1830_v14  ;;  %v334_v49 = vrot.slane %v306_v46, %v2097_v41  ;;  %1204 = vmatprep.mubr.bf16.mxu0 %v327_v47  ;;  %v337_v52 = vcombine.high %v327_v47, %v327_v47  ;;  %v1856_v58 = vld [vmem:[%s2424_s1 + $0x188] sm:$0xff]   ;;  %v1860_v62 = vld [vmem:[%s2424_s1 + $0x190] sm:$0xff]   ;;  %v1863_v0 = vld [vmem:[%s2424_s1 + $0x118] sm:$0xff]  }
  0x11   :  { %1667 = vmatpush3.bf16.msra.mxu1 %v1831_v15  ;;  %1646 = vmatprep.subr.bf16.mxu0 %v1832_v16  ;;  %v1865_v1 = vld [vmem:[%s2424_s1 + $0x160] sm:$0xff]   ;;  %v1864_v2 = vld [vmem:[%s2424_s1 + $0x198] sm:$0xff]   ;;  %v1869_v5 = vld [vmem:[%s2424_s1 + $0x168] sm:$0xff]  }
  0x12   :  { %1668 = vmatprep.subr.bf16.mxu1 %v1833_v17  ;;  %v338_v55 = vcombine.high %v334_v49, %v334_v49  ;;  %1244 = vmatprep.mubr.bf16.mxu1 %v337_v52  ;;  %v1866_v3 = vld [vmem:[%s2424_s1 + $0x1e0] sm:$0xff]   ;;  %v1870_v7 = vld [vmem:[%s2424_s1 + $0x1e8] sm:$0xff]   ;;  %v1873_v9 = vld [vmem:[%s2424_s1 + $0x170] sm:$0xff]   ;;  %v320_v17 = vrot.slane %v2101_v43, %v2097_v41 }
  0x13   :  { %v1867_v4 = vld [vmem:[%s2424_s1 + $0x120] sm:$0xff]   ;;  %v1871_v8 = vld [vmem:[%s2424_s1 + $0x128] sm:$0xff]   ;;  %v1874_v11 = vld [vmem:[%s2424_s1 + $0x1f0] sm:$0xff]  }
  0x14   :  { %1647 = vmatpush3.bf16.msra.mxu0 %v1834_v18  ;;  %v1868_v6 = vld [vmem:[%s2424_s1 + $0x1a0] sm:$0xff]   ;;  %v1872_v10 = vld [vmem:[%s2424_s1 + $0x1a8] sm:$0xff]   ;;  %v1875_v12 = vld [vmem:[%s2424_s1 + $0x130] sm:$0xff]  }
  0x15   :  { %1669 = vmatpush3.bf16.msra.mxu1 %v1835_v19  ;;  %1648 = vmatprep.subr.bf16.mxu0 %v1836_v20  ;;  %v1877_v13 = vld [vmem:[%s2424_s1 + $0x178] sm:$0xff]   ;;  %v1876_v14 = vld [vmem:[%s2424_s1 + $0x1b0] sm:$0xff]   ;;  %v1881_v18 = vld [vmem:[%s2424_s1 + $0x240] sm:$0xff]  }
  0x16   :  { %1670 = vmatprep.subr.bf16.mxu1 %v1837_v21  ;;  %v1878_v15 = vld [vmem:[%s2424_s1 + $0x1f8] sm:$0xff]   ;;  %v1882_v20 = vld [vmem:[%s2424_s1 + $0x2c0] sm:$0xff]   ;;  %v1888_v28 = vld [vmem:[%s2424_s1 + $0x288] sm:$0xff]  }
  0x17   :  { %v1879_v16 = vld [vmem:[%s2424_s1 + $0x138] sm:$0xff]   ;;  %v1883_v21 = vld [vmem:[%s2424_s1 + $0x200] sm:$0xff]   ;;  %v1901_v39 = vld [vmem:[%s2424_s1 + $0x268] sm:$0xff]  }
  0x18   :  { %1649 = vmatpush3.bf16.msra.mxu0 %v1838_v22  ;;  %v1880_v19 = vld [vmem:[%s2424_s1 + $0x1b8] sm:$0xff]   ;;  %v336_v22 = vcombine.high %v320_v17, %v320_v17  ;;  %v1898_v37 = vld [vmem:[%s2424_s1 + $0x2e0] sm:$0xff]   ;;  %v1902_v42 = vld [vmem:[%s2424_s1 + $0x2e8] sm:$0xff]  }
  0x19   :  { %1671 = vmatpush3.bf16.msra.mxu1 %v1839_v23  ;;  %1650 = vmatprep.subr.bf16.mxu0 %v1840_v24  ;;  %v1885_v23 = vld [vmem:[%s2424_s1 + $0x248] sm:$0xff]   ;;  %v1884_v24 = vld [vmem:[%s2424_s1 + $0x280] sm:$0xff]   ;;  %v1894_v33 = vld [vmem:[%s2424_s1 + $0x2d8] sm:$0xff]  }
  0x1a   :  { %1672 = vmatprep.subr.bf16.mxu1 %v1841_v25  ;;  %v1886_v25 = vld [vmem:[%s2424_s1 + $0x2c8] sm:$0xff]   ;;  %v1895_v34 = vld [vmem:[%s2424_s1 + $0x218] sm:$0xff]   ;;  %v1900_v40 = vld [vmem:[%s2424_s1 + $0x2a0] sm:$0xff]  }
  0x1b   :  { %v1896_v36 = vld [vmem:[%s2424_s1 + $0x298] sm:$0xff]   ;;  %v1903_v43 = vld [vmem:[%s2424_s1 + $0x228] sm:$0xff]   ;;  %v1905_v44 = vld [vmem:[%s2424_s1 + $0x270] sm:$0xff]  }
  0x1c   :  { %1651 = vmatpush3.bf16.msra.mxu0 %v1842_v26  ;;  %v1887_v26 = vld [vmem:[%s2424_s1 + $0x208] sm:$0xff]  }
  0x1d   :  { %1673 = vmatpush3.bf16.msra.mxu1 %v1843_v27  ;;  %1652 = vmatprep.subr.bf16.mxu0 %v1844_v29  ;;  %v1889_v27 = vld [vmem:[%s2424_s1 + $0x250] sm:$0xff]   ;;  %v1904_v46 = vld [vmem:[%s2424_s1 + $0x2a8] sm:$0xff]  }
  0x1e   :  { %1674 = vmatprep.subr.bf16.mxu1 %v1845_v30  ;;  %v1890_v29 = vld [vmem:[%s2424_s1 + $0x2d0] sm:$0xff]  }
  0x1f   :  { %v1891_v30 = vld [vmem:[%s2424_s1 + $0x210] sm:$0xff]  }
  0x20   :  { %1653 = vmatpush3.bf16.msra.mxu0 %v1846_v31  ;;  %v1893_v31 = vld [vmem:[%s2424_s1 + $0x258] sm:$0xff]  }
  0x21   :  { %1675 = vmatpush3.bf16.msra.mxu1 %v1847_v32  ;;  %1682 = vmatprep.subr.bf16.mxu0 %v1849_v35  ;;  %v1892_v32 = vld [vmem:[%s2424_s1 + $0x290] sm:$0xff]   ;;  %v1897_v35 = vld [vmem:[%s2424_s1 + $0x260] sm:$0xff]  }
  0x22   :  { %1704 = vmatprep.subr.bf16.mxu1 %v1850_v38  ;;  %v1899_v38 = vld [vmem:[%s2424_s1 + $0x220] sm:$0xff]  }
  0x23   :  { %1205 = vmatmul.mubr.bf16.vlgmr.msra.gmra.mrb[0].mxu0 %v313_v45  ;;  %v31_v45 = vld [vmem:[%s2423_s0 + $0x8] sm:$0xff] }
  0x24   :  { %1683 = vmatpush3.bf16.msra.mxu0 %v1851_v48  ;;  %1245 = vmatmul.mubr.bf16.vlgmr.msra.gmra.mrb[0].mxu1 %v335_v50  ;;  %v346_v47 = vrot.slane %v31_v45, %v2097_v41  ;;  %v339_v48 = vcombine.high %v31_v45, %v31_v45  ;;  %v1907_v50 = vld [vmem:[%s2424_s1 + $0x230] sm:$0xff]  }
  0x25   :  { %1684 = vmatprep.subr.bf16.mxu0 %v1853_v51  ;;  %1705 = vmatpush3.bf16.msra.mxu1 %v1852_v53  ;;  %v1909_v53 = vld [vmem:[%s2424_s1 + $0x278] sm:$0xff]  }
  0x26   :  { %1284 = vmatprep.mubr.bf16.mxu0 %v334_v49  ;;  %1706 = vmatprep.subr.bf16.mxu1 %v1854_v54  ;;  %v1906_v49 = vld [vmem:[%s2424_s1 + $0x2f0] sm:$0xff]   ;;  %v354_v51 = vcombine.high %v346_v47, %v346_v47  ;;  %v2286_v52 = vrot.slane %v339_v48, %v2097_v41 }
  0x27   :  { %1324 = vmatprep.mubr.bf16.mxu1 %v338_v55  ;;  %v1908_v54 = vld [vmem:[%s2424_s1 + $0x2b0] sm:$0xff]  }
  0x28   :  { %1685 = vmatpush3.bf16.msra.mxu0 %v1855_v56  ;;  %v376_v55 = vrot.slane %v354_v51, %v2097_v41  ;;  %v355_v56 = vcombine.high %v2286_v52, %v2286_v52 }
  0x29   :  { %1686 = vmatprep.subr.bf16.mxu0 %v1857_v57  ;;  %1707 = vmatpush3.bf16.msra.mxu1 %v1856_v58  ;;  %v1910_v57 = vld [vmem:[%s2424_s1 + $0x2f8] sm:$0xff]  }
  0x2a   :  { %1708 = vmatprep.subr.bf16.mxu1 %v1858_v59  ;;  %v1911_v58 = vld [vmem:[%s2424_s1 + $0x238] sm:$0xff]   ;;  %v386_v59 = vcombine.high %v376_v55, %v376_v55 }
  0x2c   :  { %1687 = vmatpush3.bf16.msra.mxu0 %v1859_v60  ;;  %v362_v60 = vrot.slane %v346_v47, %v2097_v41 }
  0x2d   :  { %1688 = vmatprep.subr.bf16.mxu0 %v1861_v61  ;;  %1709 = vmatpush3.bf16.msra.mxu1 %v1860_v62  ;;  %v1913_v61 = vld [vmem:[%s2424_s1 + $0x340] sm:$0xff]   ;;  %v1912_v62 = vld [vmem:[%s2424_s1 + $0x2b8] sm:$0xff]  }
  0x2e   :  { %1710 = vmatprep.subr.bf16.mxu1 %v1862_v63  ;;  %v383_v63 = vrot.slane %v355_v56, %v2097_v41 }
  0x30   :  { %1689 = vmatpush3.bf16.msra.mxu0 %v1863_v0  ;;  %v1914_v0 = vld [vmem:[%s2424_s1 + $0x3c0] sm:$0xff]  }
  0x31   :  { %1690 = vmatprep.subr.bf16.mxu0 %v1865_v1  ;;  %1711 = vmatpush3.bf16.msra.mxu1 %v1864_v2  ;;  %v1915_v1 = vld [vmem:[%s2424_s1 + $0x300] sm:$0xff]   ;;  %v384_v2 = vcombine.high %v362_v60, %v362_v60 }
  0x32   :  { %1712 = vmatprep.subr.bf16.mxu1 %v1866_v3  ;;  %v1917_v3 = vld [vmem:[%s2424_s1 + $0x348] sm:$0xff]  }
  0x34   :  { %1691 = vmatpush3.bf16.msra.mxu0 %v1867_v4  ;;  %v1916_v4 = vld [vmem:[%s2424_s1 + $0x380] sm:$0xff]  }
  0x35   :  { %1692 = vmatprep.subr.bf16.mxu0 %v1869_v5  ;;  %1713 = vmatpush3.bf16.msra.mxu1 %v1868_v6  ;;  %v387_v5 = vcombine.high %v383_v63, %v383_v63  ;;  %v1918_v6 = vld [vmem:[%s2424_s1 + $0x3c8] sm:$0xff]  }
  0x36   :  { %1714 = vmatprep.subr.bf16.mxu1 %v1870_v7  ;;  %v1919_v7 = vld [vmem:[%s2424_s1 + $0x308] sm:$0xff]  }
  0x38   :  { %1693 = vmatpush3.bf16.msra.mxu0 %v1871_v8  ;;  %v1921_v8 = vld [vmem:[%s2424_s1 + $0x350] sm:$0xff]  }
  0x39   :  { %1694 = vmatprep.subr.bf16.mxu0 %v1873_v9  ;;  %1715 = vmatpush3.bf16.msra.mxu1 %v1872_v10  ;;  %v1920_v9 = vld [vmem:[%s2424_s1 + $0x388] sm:$0xff]   ;;  %v1922_v10 = vld [vmem:[%s2424_s1 + $0x3d0] sm:$0xff]  }
  0x3a   :  { %1716 = vmatprep.subr.bf16.mxu1 %v1874_v11  ;;  %v1923_v11 = vld [vmem:[%s2424_s1 + $0x310] sm:$0xff]  }
  0x3c   :  { %1695 = vmatpush3.bf16.msra.mxu0 %v1875_v12  ;;  %v1925_v12 = vld [vmem:[%s2424_s1 + $0x358] sm:$0xff]  }
  0x3d   :  { %1696 = vmatprep.subr.bf16.mxu0 %v1877_v13  ;;  %1717 = vmatpush3.bf16.msra.mxu1 %v1876_v14  ;;  %v1924_v13 = vld [vmem:[%s2424_s1 + $0x390] sm:$0xff]   ;;  %v1926_v14 = vld [vmem:[%s2424_s1 + $0x3d8] sm:$0xff]  }
  0x3e   :  { %1718 = vmatprep.subr.bf16.mxu1 %v1878_v15  ;;  %v1927_v15 = vld [vmem:[%s2424_s1 + $0x318] sm:$0xff]  }
  0x40   :  { %1697 = vmatpush3.bf16.msra.mxu0 %v1879_v16  ;;  %v1929_v16 = vld [vmem:[%s2424_s1 + $0x360] sm:$0xff]  }
  0x41   :  { %1726 = vmatprep.subr.bf16.mxu0 %v1881_v18  ;;  %1719 = vmatpush3.bf16.msra.mxu1 %v1880_v19  ;;  %v1930_v18 = vld [vmem:[%s2424_s1 + $0x3e0] sm:$0xff]  }
  0x42   :  { %1748 = vmatprep.subr.bf16.mxu1 %v1882_v20  ;;  %v1931_v19 = vld [vmem:[%s2424_s1 + $0x320] sm:$0xff]   ;;  %v1933_v20 = vld [vmem:[%s2424_s1 + $0x368] sm:$0xff]  }
  0x43   :  { %1285 = vmatmul.mubr.bf16.vlgmr.msra.gmra.mrb[4].mxu0 %v320_v17  ;;  %v1928_v17 = vld [vmem:[%s2424_s1 + $0x398] sm:$0xff]  }
  0x44   :  { %1727 = vmatpush3.bf16.msra.mxu0 %v1883_v21  ;;  %1325 = vmatmul.mubr.bf16.vlgmr.msra.gmra.mrb[4].mxu1 %v336_v22  ;;  %v1932_v21 = vld [vmem:[%s2424_s1 + $0x3a0] sm:$0xff]   ;;  %v1934_v22 = vld [vmem:[%s2424_s1 + $0x3e8] sm:$0xff]  }
  0x45   :  { %1728 = vmatprep.subr.bf16.mxu0 %v1885_v23  ;;  %1749 = vmatpush3.bf16.msra.mxu1 %v1884_v24  ;;  %v1935_v23 = vld [vmem:[%s2424_s1 + $0x328] sm:$0xff]   ;;  %v1937_v24 = vld [vmem:[%s2424_s1 + $0x370] sm:$0xff]  }
  0x46   :  { %1750 = vmatprep.subr.bf16.mxu1 %v1886_v25  ;;  %1364 = vmatprep.mubr.bf16.mxu0 %v376_v55 }
  0x47   :  { %1404 = vmatprep.mubr.bf16.mxu1 %v386_v59 }
  0x48   :  { %1729 = vmatpush3.bf16.msra.mxu0 %v1887_v26 }
  0x49   :  { %1730 = vmatprep.subr.bf16.mxu0 %v1889_v27  ;;  %1751 = vmatpush3.bf16.msra.mxu1 %v1888_v28 }
  0x4a   :  { %1752 = vmatprep.subr.bf16.mxu1 %v1890_v29 }
  0x4c   :  { %1731 = vmatpush3.bf16.msra.mxu0 %v1891_v30 }
  0x4d   :  { %1732 = vmatprep.subr.bf16.mxu0 %v1893_v31  ;;  %1753 = vmatpush3.bf16.msra.mxu1 %v1892_v32 }
  0x4e   :  { %1754 = vmatprep.subr.bf16.mxu1 %v1894_v33 }
  0x50   :  { %1733 = vmatpush3.bf16.msra.mxu0 %v1895_v34 }
  0x51   :  { %1734 = vmatprep.subr.bf16.mxu0 %v1897_v35  ;;  %1755 = vmatpush3.bf16.msra.mxu1 %v1896_v36 }
  0x52   :  { %1756 = vmatprep.subr.bf16.mxu1 %v1898_v37 }
  0x54   :  { %1735 = vmatpush3.bf16.msra.mxu0 %v1899_v38 }
  0x55   :  { %1736 = vmatprep.subr.bf16.mxu0 %v1901_v39  ;;  %1757 = vmatpush3.bf16.msra.mxu1 %v1900_v40 }
  0x56   :  { %1758 = vmatprep.subr.bf16.mxu1 %v1902_v42 }
  0x58   :  { %1737 = vmatpush3.bf16.msra.mxu0 %v1903_v43 }
  0x59   :  { %1738 = vmatprep.subr.bf16.mxu0 %v1905_v44  ;;  %1759 = vmatpush3.bf16.msra.mxu1 %v1904_v46 }
  0x5a   :  { %1760 = vmatprep.subr.bf16.mxu1 %v1906_v49 }
  0x5c   :  { %1739 = vmatpush3.bf16.msra.mxu0 %v1907_v50 }
  0x5d   :  { %1740 = vmatprep.subr.bf16.mxu0 %v1909_v53  ;;  %1761 = vmatpush3.bf16.msra.mxu1 %v1908_v54 }
  0x5e   :  { %1762 = vmatprep.subr.bf16.mxu1 %v1910_v57 }
  0x60   :  { %1741 = vmatpush3.bf16.msra.mxu0 %v1911_v58 }
  0x61   :  { %1770 = vmatprep.subr.bf16.mxu0 %v1913_v61  ;;  %1763 = vmatpush3.bf16.msra.mxu1 %v1912_v62 }
  0x62   :  { %1792 = vmatprep.subr.bf16.mxu1 %v1914_v0 }
  0x63   :  { %1365 = vmatmul.mubr.bf16.vlgmr.msra.gmra.mrb[8].mxu0 %v362_v60 }
  0x64   :  { %1771 = vmatpush3.bf16.msra.mxu0 %v1915_v1  ;;  %1444 = vmatprep.mubr.bf16.mxu0 %v383_v63 }
  0x65   :  { %1405 = vmatmul.mubr.bf16.vlgmr.msra.gmra.mrb[8].mxu1 %v384_v2  ;;  %1772 = vmatprep.subr.bf16.mxu0 %v1917_v3 }
  0x66   :  { %1793 = vmatpush3.bf16.msra.mxu1 %v1916_v4  ;;  %1484 = vmatprep.mubr.bf16.mxu1 %v387_v5 }
  0x67   :  { %1794 = vmatprep.subr.bf16.mxu1 %v1918_v6 }
  0x68   :  { %1773 = vmatpush3.bf16.msra.mxu0 %v1919_v7 }
  0x69   :  { %1774 = vmatprep.subr.bf16.mxu0 %v1921_v8 }
  0x6a   :  { %1795 = vmatpush3.bf16.msra.mxu1 %v1920_v9 }
  0x6b   :  { %1796 = vmatprep.subr.bf16.mxu1 %v1922_v10 }
  0x6c   :  { %1775 = vmatpush3.bf16.msra.mxu0 %v1923_v11 }
  0x6d   :  { %1776 = vmatprep.subr.bf16.mxu0 %v1925_v12 }
  0x6e   :  { %1797 = vmatpush3.bf16.msra.mxu1 %v1924_v13 }
  0x6f   :  { %1798 = vmatprep.subr.bf16.mxu1 %v1926_v14 }
  0x70   :  { %1777 = vmatpush3.bf16.msra.mxu0 %v1927_v15 }
  0x71   :  { %1778 = vmatprep.subr.bf16.mxu0 %v1929_v16 }
  0x72   :  { %1799 = vmatpush3.bf16.msra.mxu1 %v1928_v17 }
  0x73   :  { %1800 = vmatprep.subr.bf16.mxu1 %v1930_v18 }
  0x74   :  { %1779 = vmatpush3.bf16.msra.mxu0 %v1931_v19 }
  0x75   :  { %1780 = vmatprep.subr.bf16.mxu0 %v1933_v20 }
  0x76   :  { %8 = vsyncpa [#allocation3], 0  ;;  %1801 = vmatpush3.bf16.msra.mxu1 %v1932_v21  ;;  %v1936_v25 = vld [vmem:[%s2424_s1 + $0x3a8] sm:$0xff]   ;;  %v1938_v26 = vld [vmem:[%s2424_s1 + $0x3f0] sm:$0xff]   ;;  %v369_v32 = vrot.slane %v2286_v52, %v2097_v41  ;;  %vm27_vm0 = vcmask 9216  }
  0x77   :  { %1802 = vmatprep.subr.bf16.mxu1 %v1934_v22  ;;  %v1939_v27 = vld [vmem:[%s2424_s1 + $0x330] sm:$0xff]   ;;  %v1941_v28 = vld [vmem:[%s2424_s1 + $0x378] sm:$0xff]   ;;  %v1509_v35 = vld [vmem:[%s2425_s2] ss:$0 sm:$0xff] }
  0x78   :  { %1781 = vmatpush3.bf16.msra.mxu0 %v1935_v23  ;;  %v1940_v29 = vld [vmem:[%s2424_s1 + $0x3b0] sm:$0xff]   ;;  %v1942_v30 = vld [vmem:[%s2424_s1 + $0x3f8] sm:$0xff]   ;;  %v385_v34 = vcombine.high %v369_v32, %v369_v32  ;;  %28 = vst.msk [vmem:[#allocation2] sm:$0x3] %vm27_vm0, %v1509_v35 }
  0x79   :  { %1782 = vmatprep.subr.bf16.mxu0 %v1937_v24  ;;  %v1943_v31 = vld [vmem:[%s2424_s1 + $0x338] sm:$0xff]  }
  0x7a   :  { %1803 = vmatpush3.bf16.msra.mxu1 %v1936_v25  ;;  %v1944_v33 = vld [vmem:[%s2424_s1 + $0x3b8] sm:$0xff]   ;;  %s1971_s1 = smov [#allocation2]  }
  0x7b   :  { %1804 = vmatprep.subr.bf16.mxu1 %v1938_v26  ;;  %s1501_s2 = sshll.u32 %s1971_s1, 4  ;;  %s1502_s2 = int_to_ptr.vmem [resolvable:$true] %s1501_s2 }
  0x7c   :  { %1783 = vmatpush3.bf16.msra.mxu0 %v1939_v27  ;;  %s1946_s28 = scalar_lea.vmem %s1502_s2, 32  ;;  %p1951_p1 = scmp.lt.s32.totalorder %s1502_s2, %s1502_s2 }
  0x7d   :  { %1784 = vmatprep.subr.bf16.mxu0 %v1941_v28  ;;  %p1947_p0 = scmp.ne.s32.totalorder %s1502_s2, %s1946_s28  ;;  %p1952_p2 = scmp.lt.s32.totalorder %s1946_s28, %s1946_s28 }
  0x7e   :  { %1805 = vmatpush3.bf16.msra.mxu1 %v1940_v29 }
  0x7f   :  { %1806 = vmatprep.subr.bf16.mxu1 %v1942_v30  ;;  %v29_v17 = vld [vmem:[#allocation2] sm:$0x3]  ;;  %p1953_p3 = por %p1952_p2, %p1951_p1 }
  0x80   :  { %1785 = vmatpush3.bf16.msra.mxu0 %v1943_v31 }
  0x81   :  { %p1954_p4 = pnand %p1953_p3, %p1947_p0 }
  0x82   :  { %1807 = vmatpush3.bf16.msra.mxu1 %v1944_v33 }
  0x83   :  { %1445 = vmatmul.mubr.bf16.vlgmr.msra.gmra.mrb[12].mxu0 %v369_v32 }
  0x85   :  { %1485 = vmatmul.mubr.bf16.vlgmr.msra.gmra.mrb[12].mxu1 %v385_v34 }
  0xf6   :  { %v1654_v36 = vpop.f32.mrb[0].mxu0 }
  0xf7   :  { %v1655_v41 = vpop.f32.mrb[1].mxu0  ;;  %v1676_v37 = vpop.f32.mrb[0].mxu1 }
  0xf8   :  { %v1656_v38 = vadd.f32 %v1655_v41, %v1654_v36  ;;  %v1657_v39 = vpop.f32.mrb[2].mxu0  ;;  %v1677_v40 = vpop.f32.mrb[1].mxu1 }
  0xf9   :  { %v1658_v42 = vpop.f32.mrb[3].mxu0  ;;  %v1678_v43 = vadd.f32 %v1677_v40, %v1676_v37  ;;  %v1679_v44 = vpop.f32.mrb[2].mxu1 }
  0xfa   :  { %v1680_v45 = vpop.f32.mrb[3].mxu1 }
  0xfb   :  { %v1247_v46 = vadd.f32 %v1678_v43, %v1656_v38 }
 0x116   :  { %v1698_v47 = vpop.f32.mrb[4].mxu0 }
 0x117   :  { %v1699_v48 = vpop.f32.mrb[5].mxu0  ;;  %v1720_v49 = vpop.f32.mrb[4].mxu1 }
 0x118   :  { %v1700_v50 = vadd.f32 %v1699_v48, %v1698_v47  ;;  %v1701_v51 = vpop.f32.mrb[6].mxu0  ;;  %v1721_v52 = vpop.f32.mrb[5].mxu1 }
 0x119   :  { %v1702_v53 = vpop.f32.mrb[7].mxu0  ;;  %v1722_v55 = vadd.f32 %v1721_v52, %v1720_v49  ;;  %v1723_v56 = vpop.f32.mrb[6].mxu1 }
 0x11a   :  { %v1287_v54 = vadd.f32 %v1700_v50, %v1247_v46  ;;  %v1724_v57 = vpop.f32.mrb[7].mxu1 }
 0x11c   :  { %v1327_v58 = vadd.f32 %v1722_v55, %v1287_v54 }
 0x136   :  { %v1742_v59 = vpop.f32.mrb[8].mxu0 }
 0x137   :  { %v1743_v60 = vpop.f32.mrb[9].mxu0 }
 0x138   :  { %v1764_v61 = vpop.f32.mrb[8].mxu1  ;;  %v1744_v62 = vadd.f32 %v1743_v60, %v1742_v59  ;;  %v1745_v63 = vpop.f32.mrb[10].mxu0 }
 0x139   :  { %v1765_v0 = vpop.f32.mrb[9].mxu1  ;;  %v1746_v1 = vpop.f32.mrb[11].mxu0 }
 0x13a   :  { %v1367_v2 = vadd.f32 %v1744_v62, %v1327_v58  ;;  %v1766_v3 = vadd.f32 %v1765_v0, %v1764_v61  ;;  %v1767_v4 = vpop.f32.mrb[10].mxu1 }
 0x13b   :  { %v1768_v5 = vpop.f32.mrb[11].mxu1 }
 0x13c   :  { %v1407_v6 = vadd.f32 %v1766_v3, %v1367_v2 }
 0x156   :  { %v1786_v7 = vpop.f32.mrb[12].mxu0 }
 0x157   :  { %v1787_v8 = vpop.f32.mrb[13].mxu0 }
 0x158   :  { %v1808_v9 = vpop.f32.mrb[12].mxu1  ;;  %v1788_v10 = vadd.f32 %v1787_v8, %v1786_v7  ;;  %v1789_v11 = vpop.f32.mrb[14].mxu0 }
 0x159   :  { %v1809_v12 = vpop.f32.mrb[13].mxu1  ;;  %v1790_v13 = vpop.f32.mrb[15].mxu0 }
 0x15a   :  { %v1447_v14 = vadd.f32 %v1788_v10, %v1407_v6  ;;  %v1810_v15 = vadd.f32 %v1809_v12, %v1808_v9  ;;  %v1811_v16 = vpop.f32.mrb[14].mxu1 }
 0x15b   :  { %v1812_v18 = vpop.f32.mrb[15].mxu1 }
 0x15c   :  { %v1487_v19 = vadd.f32 %v1810_v15, %v1447_v14 }
 0x15e   :  { %v1492_v20 = vadd.f32 %v1487_v19, %v29_v17 }
 0x160   :  { %1494 = vst.msk [vmem:[#allocation2] sm:$0x3] %vm27_vm0, %v1492_v20 }
 0x161   :  { %1957 = shalt.err (!%p1954_p4)
}
 0x162   :  { %s1958_s4 = scalar_lea.hbm %s2426_s3, 32 }
 0x163   :  { %p1959_p5 = scmp.ne.s32.totalorder %s2426_s3, %s1958_s4  ;;  %p1962_p6 = scmp.lt.u32.totalorder %s1958_s4, %s2426_s3 }
 0x165   :  { %p1964_p7 = pnand %p1962_p6, %p1959_p5 }
 0x167   :  { %1967 = shalt.err (!%p1964_p7)
}
 0x168   :  { %1504 = dma.vmem_to_hbm [thread:$0]  %s1502_s2, 32, %s2426_s3, [#allocation3]  }
 0x169   :  { %1968 = dma.done.wait [#allocation3], 32  }
 0x16a   :  { %1969 = vsyncadd [#allocation3], 4294967264 }
 0x16b   :  { %1508 = vsyncpa [#allocation3], 1 }

</bundles_post_ra>
